<compile_context>
chip_gen: v7x
topology: tpu7x:2x2x1
jax: 0.10.0
libtpu: 0.0.40
codegen_flags: <defaults>
</compile_context>

<pallas_src>
import jax
import jax.numpy as jnp
from jax.experimental import pallas as pl
from jax.experimental.pallas import tpu as pltpu


def target_model_kernel(x_ref, w1_ref, b1_ref, w2_ref, b2_ref, o_ref):
    # layer1: Linear(F, H) + ReLU. f32 operands, f32 accumulation on the MXU.
    h = jnp.dot(x_ref[...], w1_ref[...], preferred_element_type=jnp.float32)
    h = jnp.maximum(h + b1_ref[...], 0.0)          # bias (1, H) broadcasts to (tb, H)

    # Dropout(0.3): identity at inference (eval mode).
    # TODO(synk): training-mode dropout (pltpu.prng_seed/prng_random_bits mask) not emitted.

    # layer2: Linear(H, C). N=C is tiny; MXU pads internally, compute is trivial.
    logits = jnp.dot(h, w2_ref[...], preferred_element_type=jnp.float32) + b2_ref[...]

    # Numerically stable softmax over the class axis. Exact division (not
    # pl.reciprocal(approx=True)) so every row sums to 1 within a few f32 ulps.
    m = jnp.max(logits, axis=-1, keepdims=True)
    e = jnp.exp(logits - m)
    s = jnp.sum(e, axis=-1, keepdims=True)
    o_ref[...] = e / s


def target_model_forward(x, w1, b1, w2, b2, *, tile_b=2048):
    """x: (B, F) f32; w1: (F, H); b1: (H,) or (1, H); w2: (H, C); b2: (C,) or (1, C)."""
    B, F = x.shape
    H = w1.shape[1]
    C = w2.shape[1]

    x = x.astype(jnp.float32)
    w1 = w1.astype(jnp.float32)
    w2 = w2.astype(jnp.float32)
    b1 = b1.astype(jnp.float32).reshape(1, H)
    b2 = b2.astype(jnp.float32).reshape(1, C)

    # Batch tile: multiple of 8 sublanes; cap so the grid has >=2 steps when B allows
    # (v7x megacore sharding via dimension_semantics). Last block may be ragged:
    # OOB input rows are garbage but row-independent, and OOB output rows are dropped
    # by the bounds-masked writeback, so no host-side jnp.pad / post-slice is needed.
    half = pl.cdiv(pl.cdiv(B, 2), 8) * 8
    tb = max(8, min(tile_b, half))
    grid = (pl.cdiv(B, tb),)

    return pl.pallas_call(
        target_model_kernel,
        out_shape=jax.ShapeDtypeStruct((B, C), jnp.float32),   # compact: C lanes, no pad
        grid=grid,
        in_specs=[
            pl.BlockSpec((tb, F), lambda i: (i, 0)),            # x: tiled over batch
            pl.BlockSpec((F, H), lambda i: (0, 0)),             # w1: resident
            pl.BlockSpec((1, H), lambda i: (0, 0)),             # b1: resident
            pl.BlockSpec((H, C), lambda i: (0, 0)),             # w2: resident
            pl.BlockSpec((1, C), lambda i: (0, 0)),             # b2: resident
        ],
        out_specs=pl.BlockSpec((tb, C), lambda i: (i, 0)),
        compiler_params=pltpu.CompilerParams(
            dimension_semantics=("parallel",),                  # megacore sharding (v7x)
            vmem_limit_bytes=32 * 1024 * 1024,
        ),
    )(x, w1, b1, w2, b2)


def init_params(key, input_size, hidden_size=64, num_classes=3):
    # Deterministic init mimicking nn.Linear's U(-1/sqrt(fan_in), 1/sqrt(fan_in)).
    k1, k2, k3, k4 = jax.random.split(key, 4)
    lim1 = 1.0 / jnp.sqrt(jnp.float32(input_size))
    lim2 = 1.0 / jnp.sqrt(jnp.float32(hidden_size))
    w1 = jax.random.uniform(k1, (input_size, hidden_size), jnp.float32, -lim1, lim1)
    b1 = jax.random.uniform(k2, (hidden_size,), jnp.float32, -lim1, lim1)
    w2 = jax.random.uniform(k3, (hidden_size, num_classes), jnp.float32, -lim2, lim2)
    b2 = jax.random.uniform(k4, (num_classes,), jnp.float32, -lim2, lim2)
    return w1, b1, w2, b2


def reference_forward(x, w1, b1, w2, b2):
    h = jnp.maximum(
        jnp.dot(x, w1, precision=jax.lax.Precision.HIGHEST) + b1.reshape(1, -1), 0.0)
    logits = jnp.dot(h, w2, precision=jax.lax.Precision.HIGHEST) + b2.reshape(1, -1)
    return jax.nn.softmax(logits, axis=1)


if __name__ == "__main__":
    key = jax.random.PRNGKey(0)
    kx, kp = jax.random.split(key)

    batch, input_size, hidden_size, num_classes = 8, 32, 64, 3
    x = jax.random.normal(kx, (batch, input_size), jnp.float32)
    w1, b1, w2, b2 = init_params(kp, input_size, hidden_size, num_classes)

    out = target_model_forward(x, w1, b1, w2, b2)
    jax.block_until_ready(out)

    # sanity: shape, rows sum to ~1 (exact division), matches f32 reference
    assert out.shape == (batch, num_classes)
    assert jnp.allclose(jnp.sum(out, axis=1), 1.0, atol=1e-5)
    ref = reference_forward(x, w1, b1, w2, b2)
    assert jnp.allclose(out, ref, atol=2e-3)

    print("KERNEL_OK")
</pallas_src>

<mosaic_0001>
module attributes {stable_mosaic.version = 11 : i64} {
  func.func @target_model_kernel(%arg0: i32, %arg1: memref<8x32xf32, #tpu.memory_space<vmem>>, %arg2: memref<32x64xf32, #tpu.memory_space<vmem>>, %arg3: memref<1x64xf32, #tpu.memory_space<vmem>>, %arg4: memref<64x3xf32, #tpu.memory_space<vmem>>, %arg5: memref<1x3xf32, #tpu.memory_space<vmem>>, %arg6: memref<8x3xf32, #tpu.memory_space<vmem>>) attributes {dimension_semantics = [#tpu.dimension_semantics<parallel>], iteration_bounds = array<i64: 1>, scalar_prefetch = 0 : i64, scratch_operands = 0 : i64, tpu.core_type = #tpu.core_type<tc>, window_params = [{transform_indices = @transform_0, window_bounds = array<i64: 8, 32>}, {pipeline_mode = #tpu.pipeline_mode<synchronous>, transform_indices = @transform_1, window_bounds = array<i64: 32, 64>}, {pipeline_mode = #tpu.pipeline_mode<synchronous>, transform_indices = @transform_2, window_bounds = array<i64: 1, 64>}, {pipeline_mode = #tpu.pipeline_mode<synchronous>, transform_indices = @transform_3, window_bounds = array<i64: 64, 3>}, {pipeline_mode = #tpu.pipeline_mode<synchronous>, transform_indices = @transform_4, window_bounds = array<i64: 1, 3>}, {transform_indices = @transform_5, window_bounds = array<i64: 8, 3>}]} {
    %c0 = arith.constant 0 : index
    %c0_0 = arith.constant 0 : index
    %0 = vector.load %arg1[%c0, %c0_0] : memref<8x32xf32, #tpu.memory_space<vmem>>, vector<8x32xf32>
    %c0_1 = arith.constant 0 : index
    %c0_2 = arith.constant 0 : index
    %1 = vector.load %arg2[%c0_1, %c0_2] : memref<32x64xf32, #tpu.memory_space<vmem>>, vector<32x64xf32>
    %cst = arith.constant dense<0.000000e+00> : vector<8x64xf32>
    %2 = tpu.matmul %0, %1, %cst {dimension_numbers = #tpu.dot_dimension_numbers<[1], [0], [0], [1], [0, 0, 1, 1], [], []>} : vector<8x32xf32>, vector<32x64xf32>, vector<8x64xf32> -> vector<8x64xf32>
    %c0_3 = arith.constant 0 : index
    %c0_4 = arith.constant 0 : index
    %3 = vector.load %arg3[%c0_3, %c0_4] : memref<1x64xf32, #tpu.memory_space<vmem>>, vector<1x64xf32>
    %4 = vector.broadcast %3 : vector<1x64xf32> to vector<8x64xf32>
    %5 = arith.addf %2, %4 : vector<8x64xf32>
    %cst_5 = arith.constant 0.000000e+00 : f32
    %6 = vector.broadcast %cst_5 : f32 to vector<8x64xf32>
    %7 = arith.maximumf %5, %6 : vector<8x64xf32>
    %c0_6 = arith.constant 0 : index
    %c0_7 = arith.constant 0 : index
    %8 = vector.load %arg4[%c0_6, %c0_7] : memref<64x3xf32, #tpu.memory_space<vmem>>, vector<64x3xf32>
    %cst_8 = arith.constant dense<0.000000e+00> : vector<8x3xf32>
    %9 = tpu.matmul %7, %8, %cst_8 {dimension_numbers = #tpu.dot_dimension_numbers<[1], [0], [0], [1], [0, 0, 1, 1], [], []>} : vector<8x64xf32>, vector<64x3xf32>, vector<8x3xf32> -> vector<8x3xf32>
    %c0_9 = arith.constant 0 : index
    %c0_10 = arith.constant 0 : index
    %10 = vector.load %arg5[%c0_9, %c0_10] : memref<1x3xf32, #tpu.memory_space<vmem>>, vector<1x3xf32>
    %11 = vector.broadcast %10 : vector<1x3xf32> to vector<8x3xf32>
    %12 = arith.addf %9, %11 : vector<8x3xf32>
    %cst_11 = arith.constant dense<0xFF800000> : vector<8xf32>
    %13 = vector.multi_reduction <maximumf>, %12, %cst_11 [1] : vector<8x3xf32> to vector<8xf32>
    %14 = vector.shape_cast %13 : vector<8xf32> to vector<8x1xf32>
    %15 = vector.broadcast %14 : vector<8x1xf32> to vector<8x3xf32>
    %16 = arith.subf %12, %15 : vector<8x3xf32>
    %17 = math.exp %16 : vector<8x3xf32>
    %cst_12 = arith.constant dense<0.000000e+00> : vector<8xf32>
    %18 = vector.multi_reduction <add>, %17, %cst_12 [1] : vector<8x3xf32> to vector<8xf32>
    %19 = vector.shape_cast %18 : vector<8xf32> to vector<8x1xf32>
    %20 = vector.broadcast %19 : vector<8x1xf32> to vector<8x3xf32>
    %21 = arith.divf %17, %20 : vector<8x3xf32>
    %c0_13 = arith.constant 0 : index
    %c0_14 = arith.constant 0 : index
    %22 = vector.load %arg6[%c0_13, %c0_14] : memref<8x3xf32, #tpu.memory_space<vmem>>, vector<8x3xf32>
    tpu.vector_store %arg6[%c0_13, %c0_14], %21 {strides = array<i32>} : memref<8x3xf32, #tpu.memory_space<vmem>>, vector<8x3xf32>,
    return
  }
  func.func @transform_0(%arg0: i32) -> (i32, i32) {
    %c0_i32 = arith.constant 0 : i32
    %c0_i32_0 = arith.constant 0 : i32
    return %arg0, %c0_i32 : i32, i32
  }
  func.func @transform_1(%arg0: i32) -> (i32, i32) {
    %c0_i32 = arith.constant 0 : i32
    %c0_i32_0 = arith.constant 0 : i32
    %c0_i32_1 = arith.constant 0 : i32
    return %c0_i32, %c0_i32_0 : i32, i32
  }
  func.func @transform_2(%arg0: i32) -> (i32, i32) {
    %c0_i32 = arith.constant 0 : i32
    %c0_i32_0 = arith.constant 0 : i32
    %c0_i32_1 = arith.constant 0 : i32
    return %c0_i32, %c0_i32_0 : i32, i32
  }
  func.func @transform_3(%arg0: i32) -> (i32, i32) {
    %c0_i32 = arith.constant 0 : i32
    %c0_i32_0 = arith.constant 0 : i32
    %c0_i32_1 = arith.constant 0 : i32
    return %c0_i32, %c0_i32_0 : i32, i32
  }
  func.func @transform_4(%arg0: i32) -> (i32, i32) {
    %c0_i32 = arith.constant 0 : i32
    %c0_i32_0 = arith.constant 0 : i32
    %c0_i32_1 = arith.constant 0 : i32
    return %c0_i32, %c0_i32_0 : i32, i32
  }
  func.func @transform_5(%arg0: i32) -> (i32, i32) {
    %c0_i32 = arith.constant 0 : i32
    %c0_i32_0 = arith.constant 0 : i32
    return %arg0, %c0_i32 : i32, i32
  }
}

</mosaic_0001>

<bundles_post_ra>
// kernel: tpu_custom_call.1
= control target key start
LH: loop header
LB: loop body
LE: loop exit
PB: predicated region body
PF: predicated region fallthrough
CT: control target
= control target key end

     0   :  { %v286_v0 = vmov 0.0|0.0   ;;  %vm287_vm0 = vmmov 0   ;;  %v288_v4 = vmov 0.0   ;;  %vm32_vm1 = vcmask 261120   ;;  %s370_s1 = inlined_call_operand.vmem [shape: f32[32,64], index: 1, kind: input, shape index: {}]   ;;  %s371_s3 = inlined_call_operand.vmem [shape: f32[64,3], index: 3, kind: input, shape index: {}]   ;;  %s372_s0 = inlined_call_operand.vmem [shape: f32[8,32], index: 0, kind: input, shape index: {}]   ;;  %s373_s2 = inlined_call_operand.vmem [shape: f32[1,64], index: 2, kind: input, shape index: {}]   ;;  %s374_s4 = inlined_call_operand.vmem [shape: f32[1,3], index: 4, kind: input, shape index: {}]   ;;  %s375_s5 = inlined_call_operand.vmem [shape: f32[8,3], index: 5, kind: output, shape index: {}]  }
   0x1   :  { %261 = vmatprep.subr.bf16.mxu0 %v286_v0  ;;  %v21_v1 = vld [vmem:[%s370_s1] sm:$0xff]  ;;  %v22_v2 = vld [vmem:[%s370_s1 + $0x8] sm:$0xff]  ;;  %v23_v3 = vld [vmem:[%s370_s1 + $0x10] sm:$0xff]  ;;  %239 = vmatprep.mubr.msk.f32.mxu0 %vm287_vm0, %v288_v4  ;;  %vm122_vm2 = vcmask 523264   ;;  %vm196_vm3 = vcmask 23552  }
   0x2   :  { %v262_v5 = vpack.c.bf16 %v22_v2, %v21_v1  ;;  %v24_v6 = vld [vmem:[%s370_s1 + $0x18] sm:$0xff]  ;;  %267 = vmatprep.subr.bf16.mxu1 %v286_v0  ;;  %v107_v7 = vld [vmem:[%s371_s3] sm:$0xff]  ;;  %258 = vmatprep.mubr.msk.f32.mxu1 %vm287_vm0, %v288_v4  ;;  %v108_v8 = vld [vmem:[%s371_s3 + $0x8] sm:$0xff] }
   0x3   :  { %v109_v9 = vld [vmem:[%s371_s3 + $0x10] sm:$0xff]  ;;  %v110_v10 = vld [vmem:[%s371_s3 + $0x18] sm:$0xff]  ;;  %v265_v11 = vpack.c.bf16 %v24_v6, %v23_v3  ;;  %v268_v12 = vpack.c.bf16 %v108_v8, %v107_v7  ;;  %v111_v14 = vld [vmem:[%s371_s3 + $0x20] sm:$0xff] }
   0x4   :  { %263 = vmatpush3.bf16.msra.mxu0 %v262_v5  ;;  %v271_v13 = vpack.c.bf16 %v110_v10, %v109_v9  ;;  %v112_v15 = vld [vmem:[%s371_s3 + $0x28] sm:$0xff]  ;;  %v20_v16 = vld [vmem:[%s372_s0] sm:$0xff]  ;;  %v113_v18 = vld [vmem:[%s371_s3 + $0x30] sm:$0xff] }
   0x5   :  { %264 = vmatprep.subr.bf16.mxu0 %v286_v0  ;;  %269 = vmatpush3.bf16.msra.mxu1 %v268_v12  ;;  %v274_v17 = vpack.c.bf16 %v112_v15, %v111_v14  ;;  %v114_v19 = vld [vmem:[%s371_s3 + $0x38] sm:$0xff]  ;;  %v213_v21 = vld [vmem:[%s373_s2] ss:$0 sm:$0xff] }
   0x6   :  { %270 = vmatprep.subr.bf16.mxu1 %v286_v0  ;;  %v277_v20 = vpack.c.bf16 %v114_v19, %v113_v18  ;;  %v215_v26 = vld [vmem:[%s374_s4] ss:$0 sm:$0xff] }
   0x8   :  { %266 = vmatpush3.bf16.msra.mxu0 %v265_v11 }
   0x9   :  { %272 = vmatpush3.bf16.msra.mxu1 %v271_v13 }
   0xa   :  { %273 = vmatprep.subr.bf16.mxu1 %v286_v0 }
   0xb   :  { %240 = vmatmul.mubr.msk.f32.vlgmr.msra.gmra.mrb[0].mxu0 %vm32_vm1, %v20_v16 }
   0xd   :  { %275 = vmatpush3.bf16.msra.mxu1 %v274_v17 }
   0xe   :  { %276 = vmatprep.subr.bf16.mxu1 %v286_v0 }
  0x11   :  { %278 = vmatpush3.bf16.msra.mxu1 %v277_v20 }
  0xde   :  { %v102_v22 = vpop.f32.mrb[0].mxu0 }
  0xdf   :  { %v103_v23 = vadd.f32 %v213_v21, %v102_v22  ;;  %v241_v24 = vpop.f32.mrb[1].mxu0 }
  0xe1   :  { %v106_v25 = vmax.f32 %v103_v23, 0.0 }
  0xe3   :  { %259 = vmatmul.mubr.msk.f32.vlgmr.msra.gmra.mrb[0].mxu1 %vm122_vm2, %v106_v25 }
 0x1b6   :  { %v192_v27 = vpop.f32.mrb[0].mxu1 }
 0x1b7   :  { %v193_v28 = vadd.f32 %v215_v26, %v192_v27  ;;  %v260_v29 = vpop.f32.mrb[1].mxu1 }
 0x1b9   :  { %v197_v30 = vsel %vm196_vm3, %v193_v28, -inf }
 0x1ba   :  { %198 = vmax.xlane.f32.xlu0 %v197_v30 }
 0x247   :  { %v199_v31 = vpop.xlane.xlu0 %198 }
 0x248   :  { %v200_v32 = vsub.f32 %v193_v28, %v199_v31 }
 0x24a   :  { %v201_v33 = vmul.f32 1.442695, %v200_v32 }
 0x24c   :  { %282 = vpow2.f32 %v201_v33 }
 0x256   :  { %v283_v34 = vpop.eup %282 }
 0x257   :  { %v203_v35 = vsel %vm196_vm3, %v283_v34, 0.0 }
 0x258   :  { %204 = vadd.xlane.f32.xlu0 %v203_v35 }
 0x2e5   :  { %v205_v36 = vpop.xlane.xlu0 %204 }
 0x2e6   :  { %284 = vrcp.f32 %v205_v36 }
 0x2f0   :  { %v285_v37 = vpop.eup %284 }
 0x2f1   :  { %v207_v38 = vmul.f32 %v285_v37, %v283_v34 }
 0x2f3   :  { %208 = vst.msk [vmem:[%s375_s5] sm:$0xff] %vm196_vm3, %v207_v38 }

</bundles_post_ra>
